<compile_context>
chip_gen: v7x
topology: tpu7x:2x2x1
jax: 0.10.0
libtpu: 0.0.40
codegen_flags: <defaults>
</compile_context>

<pallas_src>
import functools

import jax
import jax.numpy as jnp
from jax.experimental import pallas as pl
from jax.experimental.pallas import tpu as pltpu

NUM_FEATURES = 32
NUM_OUTPUTS = 8
DROPOUT_RATE = 0.5
LANES = 128


def _round_up(a, b):
    return ((a + b - 1) // b) * b


def _mix_u32(x):
    """murmur3-style 32-bit finalizer (vectorized, plain integer VPU ops)."""
    x = x ^ (x >> 16)
    x = x * jnp.uint32(0x7FEB352D)
    x = x ^ (x >> 15)
    x = x * jnp.uint32(0x846CA68B)
    x = x ^ (x >> 16)
    return x


def _dropout_sampler_kernel(seed_ref, x_ref, w1_ref, b1_ref, wp_ref, bp_ref, o_ref,
                            *, dropout_rate):
    x = x_ref[...]                       # (TILE_P, 4*F) packed rows, f32
    w1 = w1_ref[...]                     # (4*F, 4*F) block-diagonal, f32
    b1 = b1_ref[...]                     # (1, 4*F)

    # --- h = relu(linear(x)) ---
    h = jnp.dot(x, w1, preferred_element_type=jnp.float32) + b1
    h = jnp.maximum(h, 0.0)

    # --- dropout (inverted dropout, integer threshold, per-element hash PRNG) ---
    if dropout_rate > 0.0:
        tile_rows, lanes = h.shape
        pid = pl.program_id(0).astype(jnp.uint32)
        base = pid * jnp.uint32(tile_rows)
        row = jax.lax.broadcasted_iota(jnp.int32, h.shape, 0).astype(jnp.uint32)
        col = jax.lax.broadcasted_iota(jnp.int32, h.shape, 1).astype(jnp.uint32)
        idx = (base + row) * jnp.uint32(lanes) + col        # unique per element
        key = seed_ref[0].astype(jnp.uint32) * jnp.uint32(0x9E3779B9)
        bits = _mix_u32(idx + key)
        bits = _mix_u32(bits ^ (key ^ jnp.uint32(0x85EBCA6B)))
        thr = jnp.uint32(min(int(round(dropout_rate * (2.0 ** 32))), 2 ** 32 - 1))
        keep = bits >= thr                                  # P(keep) = 1 - p
        h = jnp.where(keep, h * jnp.float32(1.0 / (1.0 - dropout_rate)), 0.0)

    # --- h = relu(linear(h))  (same linear weights reused, as in the module) ---
    h = jnp.dot(h, w1, preferred_element_type=jnp.float32) + b1
    h = jnp.maximum(h, 0.0)

    # --- out = predict(h) ---
    out = jnp.dot(h, wp_ref[...], preferred_element_type=jnp.float32) + bp_ref[...]
    o_ref[...] = out.astype(o_ref.dtype)


def dropout_sampler(x, params, seed, dropout_rate=DROPOUT_RATE, tile_packed_rows=2048):
    """x: (B, S, F) float32. Returns (B, S, num_outputs) float32."""
    w1, b1, wp, bp = params
    B, S, F = x.shape
    O = wp.shape[1]
    M = B * S

    # Pack `PACK` rows per 128-lane vector (PACK=4 for F=32).
    PACK = LANES // F if LANES % F == 0 else 1
    FP = PACK * F                        # packed feature width (128 for F=32)
    OP = PACK * O                        # packed output width (32 for O=8)

    MP = pl.cdiv(M, PACK)                # packed row count
    TILE_P = min(tile_packed_rows, _round_up(MP, 8))
    MP_pad = _round_up(MP, TILE_P)
    M_pad = MP_pad * PACK

    x2 = x.reshape(M, F)
    if M_pad != M:
        x2 = jnp.pad(x2, ((0, M_pad - M), (0, 0)))
    x_packed = x2.reshape(MP_pad, FP)

    # Block-diagonal weights: packed_row @ blockdiag(W) applies W to each
    # 32-lane group independently -> identical math, full MXU/lane utilization.
    eye = jnp.eye(PACK, dtype=jnp.float32)
    w1_blk = jnp.kron(eye, w1)                      # (FP, FP)
    wp_blk = jnp.kron(eye, wp)                      # (FP, OP)
    b1_blk = jnp.tile(b1, PACK).reshape(1, FP)
    bp_blk = jnp.tile(bp, PACK).reshape(1, OP)

    seed_arr = jnp.asarray([seed], dtype=jnp.int32)
    kernel = functools.partial(_dropout_sampler_kernel, dropout_rate=dropout_rate)

    grid = MP_pad // TILE_P
    out_packed = pl.pallas_call(
        kernel,
        out_shape=jax.ShapeDtypeStruct((MP_pad, OP), jnp.float32),
        grid_spec=pltpu.PrefetchScalarGridSpec(
            num_scalar_prefetch=1,
            grid=(grid,),
            in_specs=[
                pl.BlockSpec((TILE_P, FP), lambda i, s: (i, 0)),   # x (tiled over rows)
                pl.BlockSpec((FP, FP), lambda i, s: (0, 0)),       # w1 block-diag (resident)
                pl.BlockSpec((1, FP), lambda i, s: (0, 0)),        # b1
                pl.BlockSpec((FP, OP), lambda i, s: (0, 0)),       # wp block-diag (resident)
                pl.BlockSpec((1, OP), lambda i, s: (0, 0)),        # bp
            ],
            out_specs=pl.BlockSpec((TILE_P, OP), lambda i, s: (i, 0)),
        ),
        compiler_params=pltpu.CompilerParams(
            dimension_semantics=("parallel",)),                    # megacore on v7x
    )(seed_arr, x_packed, w1_blk, b1_blk, wp_blk, bp_blk)

    out = out_packed.reshape(M_pad, O)[:M]
    return out.reshape(B, S, O)


def init_params(key, num_features, num_outputs):
    """Deterministic init mimicking nn.Linear (uniform +/- 1/sqrt(fan_in))."""
    k1, k2, k3, k4 = jax.random.split(key, 4)
    bound1 = 1.0 / jnp.sqrt(num_features)
    # stored already transposed: (in, out) so kernel computes x @ W
    w1 = jax.random.uniform(k1, (num_features, num_features), jnp.float32,
                            -bound1, bound1)
    b1 = jax.random.uniform(k2, (num_features,), jnp.float32, -bound1, bound1)
    wp = jax.random.uniform(k3, (num_features, num_outputs), jnp.float32,
                            -bound1, bound1)
    bp = jax.random.uniform(k4, (num_outputs,), jnp.float32, -bound1, bound1)
    # linear2 exists in __init__ but is unused in forward -> not materialized.
    return (w1, b1, wp, bp)


if __name__ == "__main__":
    key = jax.random.PRNGKey(0)
    pkey, xkey = jax.random.split(key)

    batch, seq = 2, 8
    params = init_params(pkey, NUM_FEATURES, NUM_OUTPUTS)
    x = jax.random.normal(xkey, (batch, seq, NUM_FEATURES), jnp.float32)

    out = dropout_sampler(x, params, seed=1234)
    jax.block_until_ready(out)

    assert out.shape == (batch, seq, NUM_OUTPUTS)
    assert out.dtype == jnp.float32
    assert bool(jnp.all(jnp.isfinite(out)))
    print("KERNEL_OK")
</pallas_src>

<mosaic_0001>
module attributes {stable_mosaic.version = 11 : i64} {
  func.func @_dropout_sampler_kernel(%arg0: i32, %arg1: memref<1xi32, #tpu.memory_space<smem>>, %arg2: memref<8x128xf32, #tpu.memory_space<vmem>>, %arg3: memref<128x128xf32, #tpu.memory_space<vmem>>, %arg4: memref<1x128xf32, #tpu.memory_space<vmem>>, %arg5: memref<128x32xf32, #tpu.memory_space<vmem>>, %arg6: memref<1x32xf32, #tpu.memory_space<vmem>>, %arg7: memref<8x32xf32, #tpu.memory_space<vmem>>) attributes {dimension_semantics = [#tpu.dimension_semantics<parallel>], iteration_bounds = array<i64: 1>, scalar_prefetch = 1 : i64, scratch_operands = 0 : i64, tpu.core_type = #tpu.core_type<tc>, window_params = [{transform_indices = @transform_0, window_bounds = array<i64: 8, 128>}, {pipeline_mode = #tpu.pipeline_mode<synchronous>, transform_indices = @transform_1, window_bounds = array<i64: 128, 128>}, {pipeline_mode = #tpu.pipeline_mode<synchronous>, transform_indices = @transform_2, window_bounds = array<i64: 1, 128>}, {pipeline_mode = #tpu.pipeline_mode<synchronous>, transform_indices = @transform_3, window_bounds = array<i64: 128, 32>}, {pipeline_mode = #tpu.pipeline_mode<synchronous>, transform_indices = @transform_4, window_bounds = array<i64: 1, 32>}, {transform_indices = @transform_5, window_bounds = array<i64: 8, 32>}]} {
    %c0 = arith.constant 0 : index
    %c0_0 = arith.constant 0 : index
    %0 = vector.load %arg2[%c0, %c0_0] : memref<8x128xf32, #tpu.memory_space<vmem>>, vector<8x128xf32>
    %c0_1 = arith.constant 0 : index
    %c0_2 = arith.constant 0 : index
    %1 = vector.load %arg3[%c0_1, %c0_2] : memref<128x128xf32, #tpu.memory_space<vmem>>, vector<128x128xf32>
    %c0_3 = arith.constant 0 : index
    %c0_4 = arith.constant 0 : index
    %2 = vector.load %arg4[%c0_3, %c0_4] : memref<1x128xf32, #tpu.memory_space<vmem>>, vector<1x128xf32>
    %cst = arith.constant dense<0.000000e+00> : vector<8x128xf32>
    %3 = tpu.matmul %0, %1, %cst {dimension_numbers = #tpu.dot_dimension_numbers<[1], [0], [0], [1], [0, 0, 1, 1], [], []>} : vector<8x128xf32>, vector<128x128xf32>, vector<8x128xf32> -> vector<8x128xf32>
    %4 = vector.broadcast %2 : vector<1x128xf32> to vector<8x128xf32>
    %5 = arith.addf %3, %4 : vector<8x128xf32>
    %cst_5 = arith.constant 0.000000e+00 : f32
    %6 = vector.broadcast %cst_5 : f32 to vector<8x128xf32>
    %7 = arith.maximumf %5, %6 : vector<8x128xf32>
    %c8_i32 = arith.constant 8 : i32
    %8 = arith.muli %arg0, %c8_i32 : i32
    %9 = tpu.iota {dimensions = array<i32: 0>} : vector<8x128xi32>
    %10 = tpu.iota {dimensions = array<i32: 1>} : vector<8x128xi32>
    %11 = vector.broadcast %8 : i32 to vector<8x128xi32>
    %12 = arith.addi %11, %9 : vector<8x128xi32>
    %c128_i32 = arith.constant 128 : i32
    %13 = vector.broadcast %c128_i32 : i32 to vector<8x128xi32>
    %14 = arith.muli %12, %13 : vector<8x128xi32>
    %15 = arith.addi %14, %10 : vector<8x128xi32>
    %c0_6 = arith.constant 0 : index
    %16 = memref.load %arg1[%c0_6] : memref<1xi32, #tpu.memory_space<smem>>
    %c-1640531527_i32 = arith.constant -1640531527 : i32
    %17 = arith.muli %16, %c-1640531527_i32 : i32
    %18 = vector.broadcast %17 : i32 to vector<8x128xi32>
    %19 = arith.addi %15, %18 : vector<8x128xi32>
    %c16_i32 = arith.constant 16 : i32
    %20 = vector.broadcast %c16_i32 : i32 to vector<8x128xi32>
    %21 = arith.shrui %19, %20 : vector<8x128xi32>
    %22 = arith.xori %19, %21 : vector<8x128xi32>
    %c2146121005_i32 = arith.constant 2146121005 : i32
    %23 = vector.broadcast %c2146121005_i32 : i32 to vector<8x128xi32>
    %24 = arith.muli %22, %23 : vector<8x128xi32>
    %c15_i32 = arith.constant 15 : i32
    %25 = vector.broadcast %c15_i32 : i32 to vector<8x128xi32>
    %26 = arith.shrui %24, %25 : vector<8x128xi32>
    %27 = arith.xori %24, %26 : vector<8x128xi32>
    %c-2073254261_i32 = arith.constant -2073254261 : i32
    %28 = vector.broadcast %c-2073254261_i32 : i32 to vector<8x128xi32>
    %29 = arith.muli %27, %28 : vector<8x128xi32>
    %c16_i32_7 = arith.constant 16 : i32
    %30 = vector.broadcast %c16_i32_7 : i32 to vector<8x128xi32>
    %31 = arith.shrui %29, %30 : vector<8x128xi32>
    %32 = arith.xori %29, %31 : vector<8x128xi32>
    %c-2048144789_i32 = arith.constant -2048144789 : i32
    %33 = arith.xori %17, %c-2048144789_i32 : i32
    %34 = vector.broadcast %33 : i32 to vector<8x128xi32>
    %35 = arith.xori %32, %34 : vector<8x128xi32>
    %c16_i32_8 = arith.constant 16 : i32
    %36 = vector.broadcast %c16_i32_8 : i32 to vector<8x128xi32>
    %37 = arith.shrui %35, %36 : vector<8x128xi32>
    %38 = arith.xori %35, %37 : vector<8x128xi32>
    %c2146121005_i32_9 = arith.constant 2146121005 : i32
    %39 = vector.broadcast %c2146121005_i32_9 : i32 to vector<8x128xi32>
    %40 = arith.muli %38, %39 : vector<8x128xi32>
    %c15_i32_10 = arith.constant 15 : i32
    %41 = vector.broadcast %c15_i32_10 : i32 to vector<8x128xi32>
    %42 = arith.shrui %40, %41 : vector<8x128xi32>
    %43 = arith.xori %40, %42 : vector<8x128xi32>
    %c-2073254261_i32_11 = arith.constant -2073254261 : i32
    %44 = vector.broadcast %c-2073254261_i32_11 : i32 to vector<8x128xi32>
    %45 = arith.muli %43, %44 : vector<8x128xi32>
    %c16_i32_12 = arith.constant 16 : i32
    %46 = vector.broadcast %c16_i32_12 : i32 to vector<8x128xi32>
    %47 = arith.shrui %45, %46 : vector<8x128xi32>
    %48 = arith.xori %45, %47 : vector<8x128xi32>
    %c-2147483648_i32 = arith.constant -2147483648 : i32
    %49 = vector.broadcast %c-2147483648_i32 : i32 to vector<8x128xi32>
    %50 = arith.cmpi uge, %48, %49 : vector<8x128xi32>
    %cst_13 = arith.constant 2.000000e+00 : f32
    %51 = vector.broadcast %cst_13 : f32 to vector<8x128xf32>
    %52 = arith.mulf %7, %51 : vector<8x128xf32>
    %cst_14 = arith.constant 0.000000e+00 : f32
    %53 = vector.broadcast %cst_14 : f32 to vector<8x128xf32>
    %54 = arith.select %50, %52, %53 : vector<8x128xi1>, vector<8x128xf32>
    %cst_15 = arith.constant dense<0.000000e+00> : vector<8x128xf32>
    %55 = tpu.matmul %54, %1, %cst_15 {dimension_numbers = #tpu.dot_dimension_numbers<[1], [0], [0], [1], [0, 0, 1, 1], [], []>} : vector<8x128xf32>, vector<128x128xf32>, vector<8x128xf32> -> vector<8x128xf32>
    %56 = vector.broadcast %2 : vector<1x128xf32> to vector<8x128xf32>
    %57 = arith.addf %55, %56 : vector<8x128xf32>
    %cst_16 = arith.constant 0.000000e+00 : f32
    %58 = vector.broadcast %cst_16 : f32 to vector<8x128xf32>
    %59 = arith.maximumf %57, %58 : vector<8x128xf32>
    %c0_17 = arith.constant 0 : index
    %c0_18 = arith.constant 0 : index
    %60 = vector.load %arg5[%c0_17, %c0_18] : memref<128x32xf32, #tpu.memory_space<vmem>>, vector<128x32xf32>
    %cst_19 = arith.constant dense<0.000000e+00> : vector<8x32xf32>
    %61 = tpu.matmul %59, %60, %cst_19 {dimension_numbers = #tpu.dot_dimension_numbers<[1], [0], [0], [1], [0, 0, 1, 1], [], []>} : vector<8x128xf32>, vector<128x32xf32>, vector<8x32xf32> -> vector<8x32xf32>
    %c0_20 = arith.constant 0 : index
    %c0_21 = arith.constant 0 : index
    %62 = vector.load %arg6[%c0_20, %c0_21] : memref<1x32xf32, #tpu.memory_space<vmem>>, vector<1x32xf32>
    %63 = vector.broadcast %62 : vector<1x32xf32> to vector<8x32xf32>
    %64 = arith.addf %61, %63 : vector<8x32xf32>
    %c0_22 = arith.constant 0 : index
    %c0_23 = arith.constant 0 : index
    %65 = vector.load %arg7[%c0_22, %c0_23] : memref<8x32xf32, #tpu.memory_space<vmem>>, vector<8x32xf32>
    tpu.vector_store %arg7[%c0_22, %c0_23], %64 {strides = array<i32>} : memref<8x32xf32, #tpu.memory_space<vmem>>, vector<8x32xf32>,
    return
  }
  func.func @transform_0(%arg0: i32, %arg1: memref<1xi32, #tpu.memory_space<smem>>) -> (i32, i32) {
    %c0_i32 = arith.constant 0 : i32
    %c0_i32_0 = arith.constant 0 : i32
    return %arg0, %c0_i32 : i32, i32
  }
  func.func @transform_1(%arg0: i32, %arg1: memref<1xi32, #tpu.memory_space<smem>>) -> (i32, i32) {
    %c0_i32 = arith.constant 0 : i32
    %c0_i32_0 = arith.constant 0 : i32
    %c0_i32_1 = arith.constant 0 : i32
    return %c0_i32, %c0_i32_0 : i32, i32
  }
  func.func @transform_2(%arg0: i32, %arg1: memref<1xi32, #tpu.memory_space<smem>>) -> (i32, i32) {
    %c0_i32 = arith.constant 0 : i32
    %c0_i32_0 = arith.constant 0 : i32
    %c0_i32_1 = arith.constant 0 : i32
    return %c0_i32, %c0_i32_0 : i32, i32
  }
  func.func @transform_3(%arg0: i32, %arg1: memref<1xi32, #tpu.memory_space<smem>>) -> (i32, i32) {
    %c0_i32 = arith.constant 0 : i32
    %c0_i32_0 = arith.constant 0 : i32
    %c0_i32_1 = arith.constant 0 : i32
    return %c0_i32, %c0_i32_0 : i32, i32
  }
  func.func @transform_4(%arg0: i32, %arg1: memref<1xi32, #tpu.memory_space<smem>>) -> (i32, i32) {
    %c0_i32 = arith.constant 0 : i32
    %c0_i32_0 = arith.constant 0 : i32
    %c0_i32_1 = arith.constant 0 : i32
    return %c0_i32, %c0_i32_0 : i32, i32
  }
  func.func @transform_5(%arg0: i32, %arg1: memref<1xi32, #tpu.memory_space<smem>>) -> (i32, i32) {
    %c0_i32 = arith.constant 0 : i32
    %c0_i32_0 = arith.constant 0 : i32
    return %arg0, %c0_i32 : i32, i32
  }
}

</mosaic_0001>

<bundles_post_ra>
// kernel: tpu_custom_call.1
= control target key start
LH: loop header
LB: loop body
LE: loop exit
PB: predicated region body
PF: predicated region fallthrough
CT: control target
= control target key end

     0   :  { %v592_v3 = vmov 0.0|0.0   ;;  %vm593_vm0 = vmmov 0   ;;  %v594_v6 = vmov 0.0   ;;  %s778_s0 = inlined_call_operand.<no memory space> [shape: s32[1], index: 0, kind: input, shape index: {}]   ;;  %s779_s1 = inlined_call_operand.vmem [shape: f32[8,128], index: 1, kind: input, shape index: {}]   ;;  %s780_s2 = inlined_call_operand.vmem [shape: f32[128,128], index: 2, kind: input, shape index: {}]   ;;  %s781_s3 = inlined_call_operand.vmem [shape: f32[1,128], index: 3, kind: input, shape index: {}]   ;;  %s782_s4 = inlined_call_operand.vmem [shape: f32[128,32], index: 4, kind: input, shape index: {}]   ;;  %s783_s5 = inlined_call_operand.vmem [shape: f32[1,32], index: 5, kind: input, shape index: {}]   ;;  %s784_s6 = inlined_call_operand.hbm [shape: f32[8,32], index: 6, kind: output, shape index: {}]  }
   0x1   :  { %v24_v0 = vld [vmem:[%s780_s2] sm:$0xff]  ;;  %v25_v1 = vld [vmem:[%s780_s2 + $0x8] sm:$0xff]  ;;  %v26_v2 = vld [vmem:[%s780_s2 + $0x10] sm:$0xff]  ;;  %492 = vmatprep.subr.bf16.mxu0 %v592_v3  ;;  %419 = vmatprep.mubr.msk.f32.mxu0 %vm593_vm0, %v594_v6 }
   0x2   :  { %v493_v4 = vpack.c.bf16 %v25_v1, %v24_v0  ;;  %v27_v5 = vld [vmem:[%s780_s2 + $0x18] sm:$0xff]  ;;  %516 = vmatprep.subr.bf16.mxu1 %v592_v3  ;;  %454 = vmatprep.mubr.msk.f32.mxu1 %vm593_vm0, %v594_v6  ;;  %v28_v8 = vld [vmem:[%s780_s2 + $0x20] sm:$0xff]  ;;  %v29_v9 = vld [vmem:[%s780_s2 + $0x28] sm:$0xff] }
   0x3   :  { %v496_v7 = vpack.c.bf16 %v27_v5, %v26_v2 }
   0x4   :  { %494 = vmatpush3.bf16.msra.mxu0 %v493_v4  ;;  %518 = vmatpush3.bf16.msra.mxu1 %v493_v4 }
   0x5   :  { %495 = vmatprep.subr.bf16.mxu0 %v592_v3  ;;  %519 = vmatprep.subr.bf16.mxu1 %v592_v3 }
   0x6   :  { %12 = vsyncpa [#allocation5], 0  ;;  %v499_v10 = vpack.c.bf16 %v29_v9, %v28_v8  ;;  %v30_v11 = vld [vmem:[%s780_s2 + $0x30] sm:$0xff]  ;;  %v31_v12 = vld [vmem:[%s780_s2 + $0x38] sm:$0xff]  ;;  %v119_v48 = vlaneseq  ;;  %s128_s10 = smul.u32 2654435769, %s778_s0 }
   0x7   :  { %v502_v13 = vpack.c.bf16 %v31_v12, %v30_v11  ;;  %v32_v14 = vld [vmem:[%s780_s2 + $0x40] sm:$0xff]  ;;  %v33_v15 = vld [vmem:[%s780_s2 + $0x48] sm:$0xff]  ;;  %v34_v17 = vld [vmem:[%s780_s2 + $0x50] sm:$0xff]  ;;  %s595_s17 = smov [#allocation4]   ;;  %vm317_vm2 = vcmask 261120  }
   0x8   :  { %497 = vmatpush3.bf16.msra.mxu0 %v496_v7  ;;  %521 = vmatpush3.bf16.msra.mxu1 %v496_v7  ;;  %v505_v16 = vpack.c.bf16 %v33_v15, %v32_v14  ;;  %v35_v18 = vld [vmem:[%s780_s2 + $0x58] sm:$0xff]  ;;  %v36_v20 = vld [vmem:[%s780_s2 + $0x60] sm:$0xff]  ;;  %v37_v21 = vld [vmem:[%s780_s2 + $0x68] sm:$0xff]  ;;  %v120_v49 = vshrl.u32 %v119_v48, 7  ;;  %v122_v50 = vand.u32 127, %v119_v48  ;;  %v129_v53 = vstv %s128_s10  ;;  %s325_s18 = sshll.u32 %s595_s17, 4  ;;  %s326_s18 = int_to_ptr.vmem [resolvable:$true] %s325_s18 }
   0x9   :  { %498 = vmatprep.subr.bf16.mxu0 %v592_v3  ;;  %522 = vmatprep.subr.bf16.mxu1 %v592_v3  ;;  %v508_v19 = vpack.c.bf16 %v35_v18, %v34_v17  ;;  %v511_v22 = vpack.c.bf16 %v37_v21, %v36_v20  ;;  %v38_v23 = vld [vmem:[%s780_s2 + $0x70] sm:$0xff]  ;;  %v39_v24 = vld [vmem:[%s780_s2 + $0x78] sm:$0xff]  ;;  %v23_v26 = vld [vmem:[%s779_s1] sm:$0xff]  ;;  %s139_s11 = sxor.u32 2246822507, %s128_s10  ;;  %p573_p1 = scmp.lt.s32.totalorder %s326_s18, %s326_s18 }
   0xa   :  { %v514_v25 = vpack.c.bf16 %v39_v24, %v38_v23  ;;  %v224_v27 = vld [vmem:[%s782_s4] sm:$0xff]  ;;  %v225_v28 = vld [vmem:[%s782_s4 + $0x8] sm:$0xff]  ;;  %v226_v29 = vld [vmem:[%s782_s4 + $0x10] sm:$0xff]  ;;  %v125_v51 = vmul.u32 128, %v120_v49  ;;  %v140_v63 = vstv %s139_s11 }
   0xb   :  { %v541_v30 = vpack.c.bf16 %v225_v28, %v224_v27  ;;  %v227_v31 = vld [vmem:[%s782_s4 + $0x18] sm:$0xff]  ;;  %v228_v33 = vld [vmem:[%s782_s4 + $0x20] sm:$0xff]  ;;  %v229_v34 = vld [vmem:[%s782_s4 + $0x28] sm:$0xff] }
   0xc   :  { %500 = vmatpush3.bf16.msra.mxu0 %v499_v10  ;;  %524 = vmatpush3.bf16.msra.mxu1 %v499_v10  ;;  %v544_v32 = vpack.c.bf16 %v227_v31, %v226_v29  ;;  %v547_v35 = vpack.c.bf16 %v229_v34, %v228_v33  ;;  %v230_v36 = vld [vmem:[%s782_s4 + $0x30] sm:$0xff]  ;;  %v231_v37 = vld [vmem:[%s782_s4 + $0x38] sm:$0xff]  ;;  %v232_v39 = vld [vmem:[%s782_s4 + $0x40] sm:$0xff]  ;;  %v126_v52 = vadd.s32 %v125_v51, %v122_v50 }
   0xd   :  { %501 = vmatprep.subr.bf16.mxu0 %v592_v3  ;;  %525 = vmatprep.subr.bf16.mxu1 %v592_v3  ;;  %v550_v38 = vpack.c.bf16 %v231_v37, %v230_v36  ;;  %v233_v40 = vld [vmem:[%s782_s4 + $0x48] sm:$0xff]  ;;  %v234_v42 = vld [vmem:[%s782_s4 + $0x50] sm:$0xff]  ;;  %v235_v43 = vld [vmem:[%s782_s4 + $0x58] sm:$0xff] }
   0xe   :  { %v553_v41 = vpack.c.bf16 %v233_v40, %v232_v39  ;;  %v556_v44 = vpack.c.bf16 %v235_v43, %v234_v42  ;;  %v236_v45 = vld [vmem:[%s782_s4 + $0x60] sm:$0xff]  ;;  %v237_v46 = vld [vmem:[%s782_s4 + $0x68] sm:$0xff]  ;;  %v130_v54 = vadd.s32 %v129_v53, %v126_v52  ;;  %v238_v15 = vld [vmem:[%s782_s4 + $0x70] sm:$0xff] }
   0xf   :  { %v559_v47 = vpack.c.bf16 %v237_v46, %v236_v45  ;;  %v333_v8 = vld [vmem:[%s781_s3] ss:$0 sm:$0xff] }
  0x10   :  { %503 = vmatpush3.bf16.msra.mxu0 %v502_v13  ;;  %527 = vmatpush3.bf16.msra.mxu1 %v502_v13  ;;  %v131_v55 = vshrl.u32 %v130_v54, 16 }
  0x11   :  { %504 = vmatprep.subr.bf16.mxu0 %v592_v3  ;;  %528 = vmatprep.subr.bf16.mxu1 %v592_v3 }
  0x12   :  { %v132_v56 = vxor.u32 %v131_v55, %v130_v54 }
  0x14   :  { %506 = vmatpush3.bf16.msra.mxu0 %v505_v16  ;;  %530 = vmatpush3.bf16.msra.mxu1 %v505_v16  ;;  %v133_v57 = vmul.u32 2146121005, %v132_v56  ;;  %v239_v16 = vld [vmem:[%s782_s4 + $0x78] sm:$0xff]  ;;  %s568_s4 = scalar_lea.vmem %s326_s18, 128 }
  0x15   :  { %507 = vmatprep.subr.bf16.mxu0 %v592_v3  ;;  %531 = vmatprep.subr.bf16.mxu1 %v592_v3  ;;  %v562_v17 = vpack.c.bf16 %v239_v16, %v238_v15  ;;  %p569_p0 = scmp.ne.s32.totalorder %s326_s18, %s568_s4  ;;  %p574_p2 = scmp.lt.s32.totalorder %s568_s4, %s568_s4 }
  0x16   :  { %v134_v58 = vshrl.u32 %v133_v57, 15 }
  0x17   :  { %p575_p3 = por %p574_p2, %p573_p1 }
  0x18   :  { %509 = vmatpush3.bf16.msra.mxu0 %v508_v19  ;;  %533 = vmatpush3.bf16.msra.mxu1 %v508_v19  ;;  %v135_v59 = vxor.u32 %v134_v58, %v133_v57 }
  0x19   :  { %510 = vmatprep.subr.bf16.mxu0 %v592_v3  ;;  %534 = vmatprep.subr.bf16.mxu1 %v592_v3  ;;  %p576_p4 = pnand %p575_p3, %p569_p0 }
  0x1a   :  { %v136_v60 = vmul.u32 2221713035, %v135_v59 }
  0x1c   :  { %512 = vmatpush3.bf16.msra.mxu0 %v511_v22  ;;  %536 = vmatpush3.bf16.msra.mxu1 %v511_v22  ;;  %v137_v61 = vshrl.u32 %v136_v60, 16  ;;  %v335_v22 = vld [vmem:[%s783_s5] ss:$0 sm:$0xff] }
  0x1d   :  { %513 = vmatprep.subr.bf16.mxu0 %v592_v3  ;;  %537 = vmatprep.subr.bf16.mxu1 %v592_v3 }
  0x1e   :  { %v138_v62 = vxor.u32 %v137_v61, %v136_v60 }
  0x20   :  { %515 = vmatpush3.bf16.msra.mxu0 %v514_v25  ;;  %539 = vmatpush3.bf16.msra.mxu1 %v514_v25  ;;  %v141_v0 = vxor.u32 %v140_v63, %v138_v62 }
  0x21   :  { %540 = vmatprep.subr.bf16.mxu0 %v592_v3 }
  0x22   :  { %v142_v1 = vshrl.u32 %v141_v0, 16 }
  0x23   :  { %420 = vmatmul.mubr.f32.vlgmr.msra.gmra.mrb[0].mxu0 %v23_v26 }
  0x24   :  { %489 = vmatprep.mubr.msk.f32.mxu0 %vm593_vm0, %v594_v6  ;;  %542 = vmatpush3.bf16.msra.mxu0 %v541_v30  ;;  %v143_v2 = vxor.u32 %v142_v1, %v141_v0 }
  0x25   :  { %543 = vmatprep.subr.bf16.mxu0 %v592_v3 }
  0x28   :  { %545 = vmatpush3.bf16.msra.mxu0 %v544_v32 }
  0x29   :  { %546 = vmatprep.subr.bf16.mxu0 %v592_v3 }
  0x2c   :  { %548 = vmatpush3.bf16.msra.mxu0 %v547_v35 }
  0x2d   :  { %549 = vmatprep.subr.bf16.mxu0 %v592_v3 }
  0x30   :  { %551 = vmatpush3.bf16.msra.mxu0 %v550_v38 }
  0x31   :  { %552 = vmatprep.subr.bf16.mxu0 %v592_v3 }
  0x34   :  { %554 = vmatpush3.bf16.msra.mxu0 %v553_v41 }
  0x35   :  { %555 = vmatprep.subr.bf16.mxu0 %v592_v3 }
  0x38   :  { %557 = vmatpush3.bf16.msra.mxu0 %v556_v44 }
  0x39   :  { %558 = vmatprep.subr.bf16.mxu0 %v592_v3 }
  0x3c   :  { %560 = vmatpush3.bf16.msra.mxu0 %v559_v47 }
  0x3d   :  { %561 = vmatprep.subr.bf16.mxu0 %v592_v3  ;;  %v144_v3 = vmul.u32 2146121005, %v143_v2 }
  0x3f   :  { %v145_v4 = vshrl.u32 %v144_v3, 15 }
  0x40   :  { %563 = vmatpush3.bf16.msra.mxu0 %v562_v17 }
  0x41   :  { %v146_v5 = vxor.u32 %v145_v4, %v144_v3 }
  0x43   :  { %v147_v6 = vmul.u32 2221713035, %v146_v5 }
  0x45   :  { %v148_v7 = vshrl.u32 %v147_v6, 16 }
  0x47   :  { %v149_v10 = vxor.u32 %v148_v7, %v147_v6 }
  0x49   :  { %vm150_vm1 = vcmp.ge.u32.totalorder %v149_v10, 2147483648 }
  0xf6   :  { %v113_v9 = vpop.f32.mrb[0].mxu0 }
  0xf7   :  { %v114_v11 = vadd.f32 %v333_v8, %v113_v9  ;;  %v421_v12 = vpop.f32.mrb[1].mxu0 }
  0xf9   :  { %v117_v13 = vmax.f32 %v114_v11, 0.0 }
  0xfb   :  { %v151_v14 = vmul.f32 2.0, %v117_v13 }
  0xfd   :  { %455 = vmatmul.mubr.msk.f32.vlgmr.msra.gmra.mrb[0].mxu1 %vm150_vm1, %v151_v14 }
 0x1d0   :  { %v219_v18 = vpop.f32.mrb[0].mxu1 }
 0x1d1   :  { %v220_v19 = vadd.f32 %v333_v8, %v219_v18  ;;  %v456_v20 = vpop.f32.mrb[1].mxu1 }
 0x1d3   :  { %v223_v21 = vmax.f32 %v220_v19, 0.0 }
 0x1d5   :  { %490 = vmatmul.mubr.f32.vlgmr.msra.gmra.mrb[2].mxu0 %v223_v21 }
 0x2a8   :  { %v313_v23 = vpop.f32.mrb[2].mxu0 }
 0x2a9   :  { %v314_v24 = vadd.f32 %v335_v22, %v313_v23  ;;  %v491_v25 = vpop.f32.mrb[3].mxu0 }
 0x2ab   :  { %318 = vst.msk [vmem:[#allocation4] sm:$0xff] %vm317_vm2, %v314_v24 }
 0x2ac   :  { %579 = shalt.err (!%p576_p4)
}
 0x2ad   :  { %s580_s21 = scalar_lea.hbm %s784_s6, 128 }
 0x2ae   :  { %p581_p5 = scmp.ne.s32.totalorder %s784_s6, %s580_s21  ;;  %p584_p6 = scmp.lt.u32.totalorder %s580_s21, %s784_s6 }
 0x2b0   :  { %p586_p7 = pnand %p584_p6, %p581_p5 }
 0x2b2   :  { %589 = shalt.err (!%p586_p7)
}
 0x2b3   :  { %328 = dma.vmem_to_hbm [thread:$0]  %s326_s18, 128, %s784_s6, [#allocation5]  }
 0x2b4   :  { %590 = dma.done.wait [#allocation5], 128  }
 0x2b5   :  { %591 = vsyncadd [#allocation5], 4294967168 }
 0x2b6   :  { %332 = vsyncpa [#allocation5], 1 }

</bundles_post_ra>
